<compile_context>
chip_gen: v6e
topology: v6e:2x2x1
jax: 0.10.0
libtpu: 0.0.40
codegen_flags: <defaults>
</compile_context>

<pallas_src>
import functools

import jax
import jax.numpy as jnp
from jax.experimental import pallas as pl
from jax.experimental.pallas import tpu as pltpu


LANES = 128
SUBLANES = 8
DEFAULT_TILE_ROWS = 8192            # 8192 x 128 f32 = 4 MiB per input block
VMEM_LIMIT_BYTES = 48 * 1024 * 1024  # 2 inputs x 2 bufs x 4 MiB + temps, with headroom


def crop_to_identical_size(a: jnp.ndarray, b: jnp.ndarray):
    """Crop both 5D tensors [B, C, X, Y, Z] to their common minimal spatial size."""
    x = min(a.shape[2], b.shape[2])
    y = min(a.shape[3], b.shape[3])
    z = min(a.shape[4], b.shape[4])
    return a[:, :, :x, :y, :z], b[:, :, :x, :y, :z]


def _round_up(n: int, m: int) -> int:
    return (n + m - 1) // m * m


def _to_rows128(x: jnp.ndarray) -> jnp.ndarray:
    """[B, C, X, Y, Z] -> (B*C, R, 128) lane-dense view in the NATIVE dtype.

    When X*Y*Z is a multiple of 8*128 this is a pure reshape (no HBM copy);
    otherwise the per-(b,c) row is zero-padded (zeros contribute 0 to every
    reduction term, so this is reduction-safe).
    """
    b, c = int(x.shape[0]), int(x.shape[1])
    n = int(x.shape[2]) * int(x.shape[3]) * int(x.shape[4])
    flat = x.reshape(b * c, n)
    n_pad = _round_up(n, SUBLANES * LANES)
    if n_pad != n:
        # TODO(synk): handle the lane/sublane tail in-kernel instead of this
        # full read+write pad copy (only hit when X*Y*Z % 1024 != 0).
        flat = jnp.pad(flat, ((0, 0), (0, n_pad - n)))
    return flat.reshape(b * c, n_pad // LANES, LANES)


def _omnipose_kernel(p_ref, g_ref, out_ref, *, n_channels, acc_rows,
                     n_row_tiles, valid_rows_last):
    bc = pl.program_id(0)   # flattened (batch, channel) index -- "parallel"
    t = pl.program_id(1)    # row-tile (reduction) index -- "arbitrary"

    # Per-bc output partial lives in VMEM across the whole t axis: zero it once.
    @pl.when(t == 0)
    def _init():
        out_ref[...] = jnp.zeros_like(out_ref)

    def accumulate(valid=None):
        p = p_ref[0].astype(jnp.float32)
        g = g_ref[0].astype(jnp.float32)
        if valid is not None:
            p = jnp.where(valid, p, 0.0)
            g = jnp.where(valid, g, 0.0)
        # Fold (tile_rows, 128) -> (tile_rows/acc_rows, acc_rows, 128) and sum
        # the leading axis: pure VPU adds into a few vregs (no XLU, no
        # tile-sized accumulator stores).
        pf = p.reshape(-1, acc_rows, LANES)
        gf = g.reshape(-1, acc_rows, LANES)
        is_dice = (bc % n_channels) == 0

        @pl.when(is_dice)
        def _dice():
            out_ref[0, 0, :, :] += jnp.sum(pf * gf, axis=0)
            out_ref[0, 1, :, :] += jnp.sum(pf + gf, axis=0)

        @pl.when(jnp.logical_not(is_dice))
        def _mse():
            d = pf - gf
            out_ref[0, 2, :, :] += jnp.sum(d * d, axis=0)

    if valid_rows_last is None:
        # Common case: every tile is full -> no mask anywhere in the loop.
        accumulate()
    else:
        @pl.when(t != n_row_tiles - 1)
        def _full():
            accumulate()

        @pl.when(t == n_row_tiles - 1)
        def _ragged():
            rows = jax.lax.broadcasted_iota(jnp.int32, p_ref[0].shape, 0)
            accumulate(valid=rows < valid_rows_last)


def omnipose_loss(predicted: jnp.ndarray, ground_truth: jnp.ndarray,
                  smooth: float = 1e-10) -> jnp.ndarray:
    predicted, ground_truth = crop_to_identical_size(predicted, ground_truth)

    B, C = int(predicted.shape[0]), int(predicted.shape[1])
    n_spatial = int(predicted.shape[2]) * int(predicted.shape[3]) * int(predicted.shape[4])

    p = _to_rows128(predicted)
    g = _to_rows128(ground_truth)
    n_bc, rows_per_bc, _ = (int(d) for d in p.shape)

    tile_rows = min(DEFAULT_TILE_ROWS, rows_per_bc)          # always a multiple of 8
    n_row_tiles = (rows_per_bc + tile_rows - 1) // tile_rows
    ragged = (rows_per_bc % tile_rows) != 0
    valid_rows_last = (rows_per_bc - (n_row_tiles - 1) * tile_rows) if ragged else None

    # Partial-accumulator height: a few interleaved sublane groups keeps the
    # VPU add chain short without meaningful vreg pressure.
    if tile_rows % 32 == 0:
        acc_rows = 32
    elif tile_rows % 16 == 0:
        acc_rows = 16
    else:
        acc_rows = 8

    kernel = functools.partial(
        _omnipose_kernel, n_channels=C, acc_rows=acc_rows,
        n_row_tiles=n_row_tiles, valid_rows_last=valid_rows_last)

    partials = pl.pallas_call(
        kernel,
        out_shape=jax.ShapeDtypeStruct((n_bc, 3, acc_rows, LANES), jnp.float32),
        grid_spec=pltpu.PrefetchScalarGridSpec(
            num_scalar_prefetch=0,
            grid=(n_bc, n_row_tiles),
            in_specs=[
                pl.BlockSpec((1, tile_rows, LANES), lambda bc, t: (bc, t, 0)),
                pl.BlockSpec((1, tile_rows, LANES), lambda bc, t: (bc, t, 0)),
            ],
            out_specs=pl.BlockSpec((1, 3, acc_rows, LANES),
                                   lambda bc, t: (bc, 0, 0, 0)),
        ),
        compiler_params=pltpu.CompilerParams(
            dimension_semantics=("parallel", "arbitrary"),
            vmem_limit_bytes=VMEM_LIMIT_BYTES),
    )(p, g)

    # Tiny cross-bc combine + scalar math in the wrapper.
    sums = partials.sum(axis=(0, 2, 3))          # (3,): intersection, denom, sse
    intersection = sums[0] + smooth
    denominator = sums[1] + smooth
    dice = 1.0 - 2.0 * intersection / denominator
    if C <= 1:
        # Guard the zero MSE divisor (reference would yield NaN for C == 1).
        return dice
    mse = sums[2] / float(B * (C - 1) * n_spatial)
    return dice + mse


def omnipose_loss_ref(predicted, ground_truth, smooth: float = 1e-10):
    """Pure-JAX reference matching the PyTorch module."""
    predicted, ground_truth = crop_to_identical_size(predicted, ground_truth)
    intersection = (predicted[:, 0, ...] * ground_truth[:, 0, ...]).sum() + smooth
    denominator = (predicted[:, 0, ...] + ground_truth[:, 0, ...]).sum() + smooth
    loss = 1.0 - 2.0 * intersection / denominator
    mse = jnp.mean((predicted[:, 1:, ...] - ground_truth[:, 1:, ...]) ** 2)
    return loss + mse


if __name__ == "__main__":
    key = jax.random.PRNGKey(0)
    k1, k2 = jax.random.split(key)
    # Small shapes consistent with [B, 5, X, Y, Z].
    B, C, X, Y, Z = 2, 5, 8, 8, 8
    predicted = jax.random.uniform(k1, (B, C, X, Y, Z), dtype=jnp.float32)
    ground_truth = jax.random.uniform(k2, (B, C, X, Y, Z), dtype=jnp.float32)

    loss = jax.block_until_ready(omnipose_loss(predicted, ground_truth))
    ref = jax.block_until_ready(omnipose_loss_ref(predicted, ground_truth))
    assert jnp.allclose(loss, ref, rtol=1e-5, atol=1e-6), (loss, ref)

    print("KERNEL_OK")
</pallas_src>

<mosaic_0001>
module attributes {stable_mosaic.version = 11 : i64} {
  func.func @_omnipose_kernel(%arg0: i32, %arg1: i32, %arg2: memref<1x8x128xf32, #tpu.memory_space<vmem>>, %arg3: memref<1x8x128xf32, #tpu.memory_space<vmem>>, %arg4: memref<1x3x8x128xf32, #tpu.memory_space<vmem>>) attributes {dimension_semantics = [#tpu.dimension_semantics<parallel>, #tpu.dimension_semantics<arbitrary>], iteration_bounds = array<i64: 10, 1>, scalar_prefetch = 0 : i64, scratch_operands = 0 : i64, tpu.core_type = #tpu.core_type<tc>, window_params = [{transform_indices = @transform_0, window_bounds = array<i64: 1, 8, 128>}, {transform_indices = @transform_1, window_bounds = array<i64: 1, 8, 128>}, {transform_indices = @transform_2, window_bounds = array<i64: 1, 3, 8, 128>}]} {
    %c0_i32 = arith.constant 0 : i32
    %0 = arith.cmpi eq, %arg1, %c0_i32 : i32
    %1 = arith.extui %0 : i1 to i32
    %c0_i32_0 = arith.constant 0 : i32
    %2 = arith.cmpi ne, %1, %c0_i32_0 : i32
    scf.if %2 {
      %cst = arith.constant 0.000000e+00 : f32
      %25 = vector.broadcast %cst : f32 to vector<1x3x8x128xf32>
      %c0_13 = arith.constant 0 : index
      %c0_14 = arith.constant 0 : index
      %c0_15 = arith.constant 0 : index
      %c0_16 = arith.constant 0 : index
      %26 = vector.load %arg4[%c0_13, %c0_14, %c0_15, %c0_16] : memref<1x3x8x128xf32, #tpu.memory_space<vmem>>, vector<1x3x8x128xf32>
      tpu.vector_store %arg4[%c0_13, %c0_14, %c0_15, %c0_16], %25 {strides = array<i32>} : memref<1x3x8x128xf32, #tpu.memory_space<vmem>>, vector<1x3x8x128xf32>,
    } else {
    }
    %c0 = arith.constant 0 : index
    %c0_1 = arith.constant 0 : index
    %c0_2 = arith.constant 0 : index
    %3 = vector.load %arg2[%c0, %c0_1, %c0_2] : memref<1x8x128xf32, #tpu.memory_space<vmem>>, vector<1x8x128xf32>
    %4 = vector.shape_cast %3 : vector<1x8x128xf32> to vector<8x128xf32>
    %c0_3 = arith.constant 0 : index
    %c0_4 = arith.constant 0 : index
    %c0_5 = arith.constant 0 : index
    %5 = vector.load %arg3[%c0_3, %c0_4, %c0_5] : memref<1x8x128xf32, #tpu.memory_space<vmem>>, vector<1x8x128xf32>
    %6 = vector.shape_cast %5 : vector<1x8x128xf32> to vector<8x128xf32>
    %7 = vector.shape_cast %4 : vector<8x128xf32> to vector<1x8x128xf32>
    %8 = vector.shape_cast %6 : vector<8x128xf32> to vector<1x8x128xf32>
    %c5_i32 = arith.constant 5 : i32
    %c0_i32_6 = arith.constant 0 : i32
    %9 = arith.cmpi eq, %c5_i32, %c0_i32_6 : i32
    %c1_i32 = arith.constant 1 : i32
    %10 = arith.select %9, %c1_i32, %c5_i32 : i32
    %11 = arith.remsi %arg0, %10 : i32
    %c0_i32_7 = arith.constant 0 : i32
    %12 = arith.cmpi ne, %11, %c0_i32_7 : i32
    %c0_i32_8 = arith.constant 0 : i32
    %13 = arith.cmpi slt, %11, %c0_i32_8 : i32
    %c0_i32_9 = arith.constant 0 : i32
    %14 = arith.cmpi slt, %10, %c0_i32_9 : i32
    %15 = arith.xori %13, %14 : i1
    %16 = arith.andi %15, %12 : i1
    %17 = arith.addi %11, %10 : i32
    %18 = arith.select %16, %17, %11 : i32
    %c0_i32_10 = arith.constant 0 : i32
    %19 = arith.cmpi eq, %18, %c0_i32_10 : i32
    %20 = arith.extui %19 : i1 to i32
    %c0_i32_11 = arith.constant 0 : i32
    %21 = arith.cmpi ne, %20, %c0_i32_11 : i32
    scf.if %21 {
      %c0_13 = arith.constant 0 : index
      %c0_14 = arith.constant 0 : index
      %c0_15 = arith.constant 0 : index
      %c0_16 = arith.constant 0 : index
      %25 = vector.load %arg4[%c0_13, %c0_14, %c0_15, %c0_16] : memref<1x3x8x128xf32, #tpu.memory_space<vmem>>, vector<1x1x8x128xf32>
      %26 = vector.shape_cast %25 : vector<1x1x8x128xf32> to vector<8x128xf32>
      %27 = arith.mulf %7, %8 : vector<1x8x128xf32>
      %cst = arith.constant dense<0.000000e+00> : vector<8x128xf32>
      %28 = vector.multi_reduction <add>, %27, %cst [0] : vector<1x8x128xf32> to vector<8x128xf32>
      %29 = arith.addf %26, %28 : vector<8x128xf32>
      %c0_17 = arith.constant 0 : index
      %c0_18 = arith.constant 0 : index
      %c0_19 = arith.constant 0 : index
      %c0_20 = arith.constant 0 : index
      %30 = vector.load %arg4[%c0_17, %c0_18, %c0_19, %c0_20] : memref<1x3x8x128xf32, #tpu.memory_space<vmem>>, vector<1x1x8x128xf32>
      %31 = vector.shape_cast %30 : vector<1x1x8x128xf32> to vector<8x128xf32>
      %32 = vector.shape_cast %29 : vector<8x128xf32> to vector<1x1x8x128xf32>
      tpu.vector_store %arg4[%c0_17, %c0_18, %c0_19, %c0_20], %32 {strides = array<i32>} : memref<1x3x8x128xf32, #tpu.memory_space<vmem>>, vector<1x1x8x128xf32>,
      %c0_21 = arith.constant 0 : index
      %c1 = arith.constant 1 : index
      %c0_22 = arith.constant 0 : index
      %c0_23 = arith.constant 0 : index
      %33 = vector.load %arg4[%c0_21, %c1, %c0_22, %c0_23] : memref<1x3x8x128xf32, #tpu.memory_space<vmem>>, vector<1x1x8x128xf32>
      %34 = vector.shape_cast %33 : vector<1x1x8x128xf32> to vector<8x128xf32>
      %35 = arith.addf %7, %8 : vector<1x8x128xf32>
      %cst_24 = arith.constant dense<0.000000e+00> : vector<8x128xf32>
      %36 = vector.multi_reduction <add>, %35, %cst_24 [0] : vector<1x8x128xf32> to vector<8x128xf32>
      %37 = arith.addf %34, %36 : vector<8x128xf32>
      %c0_25 = arith.constant 0 : index
      %c1_26 = arith.constant 1 : index
      %c0_27 = arith.constant 0 : index
      %c0_28 = arith.constant 0 : index
      %38 = vector.load %arg4[%c0_25, %c1_26, %c0_27, %c0_28] : memref<1x3x8x128xf32, #tpu.memory_space<vmem>>, vector<1x1x8x128xf32>
      %39 = vector.shape_cast %38 : vector<1x1x8x128xf32> to vector<8x128xf32>
      %40 = vector.shape_cast %37 : vector<8x128xf32> to vector<1x1x8x128xf32>
      tpu.vector_store %arg4[%c0_25, %c1_26, %c0_27, %c0_28], %40 {strides = array<i32>} : memref<1x3x8x128xf32, #tpu.memory_space<vmem>>, vector<1x1x8x128xf32>,
    } else {
    }
    %true = arith.constant true
    %22 = arith.xori %19, %true : i1
    %23 = arith.extui %22 : i1 to i32
    %c0_i32_12 = arith.constant 0 : i32
    %24 = arith.cmpi ne, %23, %c0_i32_12 : i32
    scf.if %24 {
      %25 = arith.subf %7, %8 : vector<1x8x128xf32>
      %c0_13 = arith.constant 0 : index
      %c2 = arith.constant 2 : index
      %c0_14 = arith.constant 0 : index
      %c0_15 = arith.constant 0 : index
      %26 = vector.load %arg4[%c0_13, %c2, %c0_14, %c0_15] : memref<1x3x8x128xf32, #tpu.memory_space<vmem>>, vector<1x1x8x128xf32>
      %27 = vector.shape_cast %26 : vector<1x1x8x128xf32> to vector<8x128xf32>
      %28 = arith.mulf %25, %25 : vector<1x8x128xf32>
      %cst = arith.constant dense<0.000000e+00> : vector<8x128xf32>
      %29 = vector.multi_reduction <add>, %28, %cst [0] : vector<1x8x128xf32> to vector<8x128xf32>
      %30 = arith.addf %27, %29 : vector<8x128xf32>
      %c0_16 = arith.constant 0 : index
      %c2_17 = arith.constant 2 : index
      %c0_18 = arith.constant 0 : index
      %c0_19 = arith.constant 0 : index
      %31 = vector.load %arg4[%c0_16, %c2_17, %c0_18, %c0_19] : memref<1x3x8x128xf32, #tpu.memory_space<vmem>>, vector<1x1x8x128xf32>
      %32 = vector.shape_cast %31 : vector<1x1x8x128xf32> to vector<8x128xf32>
      %33 = vector.shape_cast %30 : vector<8x128xf32> to vector<1x1x8x128xf32>
      tpu.vector_store %arg4[%c0_16, %c2_17, %c0_18, %c0_19], %33 {strides = array<i32>} : memref<1x3x8x128xf32, #tpu.memory_space<vmem>>, vector<1x1x8x128xf32>,
    } else {
    }
    return
  }
  func.func @transform_0(%arg0: i32, %arg1: i32) -> (i32, i32, i32) {
    %c0_i32 = arith.constant 0 : i32
    %c0_i32_0 = arith.constant 0 : i32
    return %arg0, %arg1, %c0_i32 : i32, i32, i32
  }
  func.func @transform_1(%arg0: i32, %arg1: i32) -> (i32, i32, i32) {
    %c0_i32 = arith.constant 0 : i32
    %c0_i32_0 = arith.constant 0 : i32
    return %arg0, %arg1, %c0_i32 : i32, i32, i32
  }
  func.func @transform_2(%arg0: i32, %arg1: i32) -> (i32, i32, i32, i32) {
    %c0_i32 = arith.constant 0 : i32
    %c0_i32_0 = arith.constant 0 : i32
    %c0_i32_1 = arith.constant 0 : i32
    %c0_i32_2 = arith.constant 0 : i32
    return %arg0, %c0_i32, %c0_i32_0, %c0_i32_1 : i32, i32, i32, i32
  }
}

</mosaic_0001>

<bundles_post_ra>
// kernel: tpu_custom_call.1
= control target key start
LH: loop header
LB: loop body
LE: loop exit
PB: predicated region body
PF: predicated region fallthrough
CT: control target
= control target key end

     0   :  { %7 = vsyncpa [#allocation3], 0  ;;  %s832_s0 = inlined_call_operand.hbm [shape: f32[10,8,128], index: 0, kind: input, shape index: {}]   ;;  %s833_s1 = inlined_call_operand.hbm [shape: f32[10,8,128], index: 1, kind: input, shape index: {}]   ;;  %s834_s2 = inlined_call_operand.hbm [shape: f32[10,3,8,128], index: 2, kind: output, shape index: {}]  }
   0x1   :  { %9 = vsyncpa [#allocation3 + $0x1], 0 }
   0x2   :  { %10 = vsyncpa [#allocation6], 0 }
   0x3   :  { %12 = vsyncpa [#allocation6 + $0x1], 0 }
   0x4   :  { %13 = vsyncpa [#allocation4], 0 }
   0x5   :  { %15 = vsyncpa [#allocation4 + $0x1], 0  ;;  %s643_s9 = smov 0   ;;  %s645_s10 = smov 0  }
   0x6   :  { %s647_s11 = smov 0   ;;  %s649_s12 = smov 0  }
   0x7   :  { %s651_s13 = smov 0   ;;  %s653_s14 = smov 0  }
   0x8 LB: > { %s382_s15 = sadd.s32 4294967295, %s620_s14   ;;  %s383_s16 = sadd.s32 4294967294, %s620_s14   ;;  %s620_s14 = sphi %s653_s14, %s21_s14   ;;  %s616_s13 = sphi %s651_s13, %s845_s13   ;;  %s612_s12 = sphi %s649_s12, %s844_s12   ;;  %s608_s11 = sphi %s647_s11, %s843_s11   ;;  %s604_s10 = sphi %s645_s10, %s842_s10   ;;  %s600_s9 = sphi %s643_s9, %s841_s9  }
   0x9   : > { %s33_s17 = sadd.s32 1, %s616_s13  ;;  %s42_s18 = sadd.s32 1, %s608_s11 }
   0xa   : > { %p35_p0 = scmp.ge.s32.totalorder %s33_s17, 10  ;;  %p49_p1 = scmp.ne.s32.totalorder %s608_s11, %s604_s10 }
   0xb   : > { %p50_p2 = scmp.eq.s32.totalorder %s620_s14, 0  ;;  %p55_p3 = scmp.ne.s32.totalorder %s604_s10, %s600_s9 }
   0xc   : > { %s847_s17 = smov (%p35_p0, %s33_s17), 0  ;;  %p56_p5 = scmp.eq.s32.totalorder %s382_s15, 0 }
   0xd   : > { %p684_p4 = por %p50_p2, %p49_p1  ;;  %s37_s20 = ssub.s32 %s616_s13, %s847_s17 }
   0xe   : > { %p107_p6 = scmp.eq.s32.totalorder %s382_s15, 9  ;;  %p40_p7 = scmp.eq.s32.totalorder %s37_s20, 0 }
   0xf   : > { %p690_p8 = por %p56_p5, %p55_p3  ;;  %p113_p10 = scmp.eq.s32.totalorder %s383_s16, 9 }
  0x10   : > { %p694_p9 = por %p107_p6, %p49_p1  ;;  %p424_p12 = scmp.lt.s32.totalorder %s620_s14, 10 }
  0x11   : > { %s699_s23 = scalar_select %p40_p7, %s608_s11, %s42_s18  }
  0x12   : > { %p701_p11 = por %p113_p10, %p55_p3  ;;  %s707_s25 = sand.u32 1, %s608_s11  }
  0x13   : > { %s386_s26 = sshll.u32 %s707_s25, 3  ;;  %s387_s27 = sshll.u32 %s616_s13, 7 }
  0x14   : > { %s143_s30 = scalar_lea.hbm %s832_s0, %s387_s27  ;;  %s137_s3 = scalar_lea.vmem [#allocation2], %s386_s26 }
  0x15   : > { %s145_s4 = sshll.u32 %s137_s3, 4  ;;  %p716_p13 = pnand %p424_p12, %p684_p4  ;;  %s146_s4 = int_to_ptr.vmem [resolvable:$true] %s145_s4 }
  0x16   : > { %p390_p0 = scmp.ge.s32.totalorder %s620_s14, 1  ;;  %p169_p1 = scmp.lt.s32.totalorder %s620_s14, 11 }
  0x17   : > { %s134_s6 = scalar_lea.sflag [#allocation3], %s707_s25  ;;  %p482_p2 = pneg %p716_p13 }
  0x18   : > { %s493_s7 = scalar_lea.vmem %s146_s4, 128  ;;  %s622_s8 = smov [#allocation2]  }
  0x19   : > { %p494_p3 = scmp.ne.s32.totalorder %s146_s4, %s493_s7  ;;  %s498_s15 = sshll.u32 %s622_s8, 4  ;;  %s499_s15 = int_to_ptr.vmem [resolvable:$false] %s498_s15 }
  0x1a   : > { %s500_s16 = scalar_lea.vmem %s499_s15, 256  ;;  %p501_p4 = scmp.lt.s32.totalorder %s146_s4, %s499_s15 }
  0x1b   : > { %p496_p5 = pnand %p494_p3, %p482_p2  ;;  %p502_p7 = scmp.lt.s32.totalorder %s500_s16, %s493_s7 }
  0x1d   : > { %p497_p6 = pneg %p496_p5  ;;  %p503_p10 = por %p502_p7, %p501_p4 }
  0x1f   : > { %p504_p12 = pnand %p503_p10, %p497_p6 }
  0x21   : > { %507 = shalt.err (!%p504_p12)
}
  0x22   : > { %416 = dma.hbm_to_vmem [thread:$0]  (!%p716_p13), %s143_s30, 128, %s146_s4, %s134_s6  }
  0x23   : > { %p734_p3 = pnand %p390_p0, %p169_p1  ;;  %s162_s28 = scalar_lea.hbm %s833_s1, %s387_s27 }
  0x24   : > { %s156_s29 = scalar_lea.vmem [#allocation5], %s386_s26  ;;  %s153_s7 = scalar_lea.sflag [#allocation6], %s707_s25 }
  0x25   : > { %s164_s3 = sshll.u32 %s156_s29, 4  ;;  %s623_s30 = smov [#allocation5]   ;;  %s165_s3 = int_to_ptr.vmem [resolvable:$true] %s164_s3 }
  0x26   : > { %s521_s8 = scalar_lea.vmem %s165_s3, 128  ;;  %s526_s4 = sshll.u32 %s623_s30, 4  ;;  %s527_s4 = int_to_ptr.vmem [resolvable:$false] %s526_s4 }
  0x27   : > { %p522_p5 = scmp.ne.s32.totalorder %s165_s3, %s521_s8  ;;  %s528_s6 = scalar_lea.vmem %s527_s4, 256 }
  0x28   : > { %p529_p0 = scmp.lt.s32.totalorder %s165_s3, %s527_s4  ;;  %p530_p1 = scmp.lt.s32.totalorder %s528_s6, %s521_s8 }
  0x29   : > { %p524_p6 = pnand %p522_p5, %p482_p2 }
  0x2a   : > { %p531_p7 = por %p530_p1, %p529_p0 }
  0x2b   : > { %p525_p4 = pneg %p524_p6 }
  0x2d   : > { %p532_p10 = pnand %p531_p7, %p525_p4 }
  0x2f   : > { %535 = shalt.err (!%p532_p10)
}
  0x30   : > { %419 = dma.hbm_to_vmem [thread:$0]  (!%p716_p13), %s162_s28, 128, %s165_s3, %s153_s7  }
  0x31   : > { %173 = sbr.rel (%p734_p3) target bundleno = 125 (0x7d), region = 28  ;;  %s750_s25 = sand.u32 (!%p734_p3), 1, %s604_s10  }
  0x32   : > { %s391_s26 = sshll.u32 (!%p734_p3), %s750_s25, 3  ;;  %s176_s27 = scalar_lea.sflag (!%p734_p3), [#allocation3], %s750_s25 }
  0x33   : > { %s179_s15 = scalar_lea.vmem (!%p734_p3), [#allocation2], %s391_s26 }
  0x36   : > { %587 = dma.done.wait (%p690_p8), %s176_s27, 128  }
  0x37   : > { %589 = vsyncadd (%p690_p8), %s176_s27, 4294967168  ;;  %s185_s5 = scalar_lea.sflag [#allocation6], %s750_s25  ;;  %s188_s16 = scalar_lea.vmem [#allocation5], %s391_s26 }
  0x38   : > { %591 = dma.done.wait (%p690_p8), %s185_s5, 128  }
  0x39   : > { %593 = vsyncadd (%p690_p8), %s185_s5, 4294967168  ;;  %s405_s18 = smul.u32 24, %s750_s25  ;;  %s224_s19 = ssub.s32 0, %s612_s12  ;;  %v624_v0 = vmov 0.0   ;;  %v221_v1 = vld [vmem:[%s179_s15] sm:$0xff]  ;;  %v222_v2 = vld [vmem:[%s188_s16] sm:$0xff] }
  0x3a   : > { %s393_s20 = smin.u32 %s612_s12, %s224_s19  ;;  %p223_p8 = scmp.lt.s32.totalorder %s612_s12, 0 }
  0x3b   : > { %s766_s28 = scalar_lea.vmem [#allocation7], %s405_s18  ;;  %478 = sdivrem.u32 %s393_s20, 5 }
  0x3c   : > { %218 = vst [vmem:[%s766_s28] sm:$0xff] %v624_v0  ;;  %219 = vst [vmem:[%s766_s28 + $0x8] sm:$0xff] %v624_v0 }
  0x3d   : > { %220 = vst [vmem:[%s766_s28 + $0x10] sm:$0xff] %v624_v0 }
  0x44   : > { %s479_s21 = spop.drf %478 }
  0x45   : > { %s228_s29 = ssub.s32 0, %s479_s21 }
  0x46   : > { %s849_s29 = smov (!%p223_p8, %s228_s29), %s479_s21 }
  0x47   : > { %p395_p13 = scmp.lt.s32.totalorder %s849_s29, 0  ;;  %s234_s3 = sadd.s32 5, %s849_s29 }
  0x49   : > { %s851_s3 = smov (!%p395_p13, %s234_s3), %s849_s29 }
  0x4a   : > { %p396_p2 = scmp.ne.s32.totalorder %s851_s3, 0 }
  0x4c   : > { %239 = sbr.rel (%p396_p2) target bundleno = 86 (0x56), region = 44 }
  0x51   : > { %v240_v3 = vld [vmem:[%s766_s28] sm:$0xff]  ;;  %v241_v4 = vmul.f32 %v222_v2, %v221_v1  ;;  %v397_v5 = vld [vmem:[%s766_s28 + $0x8] sm:$0xff]  ;;  %v247_v6 = vadd.f32 %v222_v2, %v221_v1 }
  0x53   : > { %v243_v7 = vadd.f32 %v241_v4, %v240_v3  ;;  %v249_v8 = vadd.f32 %v397_v5, %v247_v6 }
  0x55   : > { %244 = vst [vmem:[%s766_s28] sm:$0xff] %v243_v7  ;;  %398 = vst [vmem:[%s766_s28 + $0x8] sm:$0xff] %v249_v8 }
  0x56 PF: > { %p399_p12 = scmp.eq.s32.totalorder %s851_s3, 0 }
  0x58   : > { %254 = sbr.rel (%p399_p12) target bundleno = 100 (0x64), region = 48 }
  0x5d   : > { %v255_v9 = vsub.f32 %v221_v1, %v222_v2  ;;  %v400_v10 = vld [vmem:[%s766_s28 + $0x10] sm:$0xff] }
  0x5f   : > { %v258_v11 = vmul.f32 %v255_v9, %v255_v9 }
  0x61   : > { %v260_v12 = vadd.f32 %v400_v10, %v258_v11 }
  0x63   : > { %401 = vst [vmem:[%s766_s28 + $0x10] sm:$0xff] %v260_v12 }
  0x64 PF: > { %s406_s7 = smul.u32 384, %s612_s12  ;;  %s276_s8 = sshll.u32 %s766_s28, 4  ;;  %s785_s8 = int_to_ptr.vmem [resolvable:$true] %s276_s8 }
  0x65   : > { %s263_s26 = scalar_lea.sflag [#allocation4], %s750_s25  ;;  %s536_s27 = scalar_lea.vmem %s785_s8, 384 }
  0x66   : > { %s783_s6 = scalar_lea.hbm %s834_s2, %s406_s7  ;;  %p537_p3 = scmp.ne.s32.totalorder %s785_s8, %s536_s27 }
  0x67   : > { %s625_s15 = smov [#allocation7]  }
  0x68   : > { %p538_p5 = pnand %p537_p3, %p694_p9  ;;  %s540_s5 = sshll.u32 %s625_s15, 4  ;;  %s541_s5 = int_to_ptr.vmem [resolvable:$false] %s540_s5 }
  0x69   : > { %s542_s12 = scalar_lea.vmem %s541_s5, 768  ;;  %p543_p4 = scmp.lt.s32.totalorder %s785_s8, %s541_s5 }
  0x6a   : > { %p539_p6 = pneg %p538_p5  ;;  %p544_p0 = scmp.lt.s32.totalorder %s542_s12, %s536_s27 }
  0x6c   : > { %p545_p1 = por %p544_p0, %p543_p4 }
  0x6e   : > { %p546_p7 = pnand %p545_p1, %p539_p6 }
  0x70   : > { %549 = shalt.err (!%p546_p7)
}
  0x71   : > { %s550_s16 = scalar_lea.hbm %s783_s6, 384  ;;  %s554_s20 = scalar_lea.hbm %s834_s2, 3840 }
  0x72   : > { %p551_p10 = scmp.ne.s32.totalorder %s783_s6, %s550_s16  ;;  %p555_p2 = scmp.lt.s32.totalorder %s783_s6, %s834_s2 }
  0x73   : > { %p556_p12 = scmp.lt.s32.totalorder %s554_s20, %s550_s16 }
  0x74   : > { %p552_p8 = pnand %p551_p10, %p694_p9 }
  0x75   : > { %p557_p3 = por %p556_p12, %p555_p2 }
  0x76   : > { %p553_p13 = pneg %p552_p8 }
  0x78   : > { %p558_p5 = pnand %p557_p3, %p553_p13 }
  0x7a   : > { %561 = shalt.err (!%p558_p5)
}
  0x7b   : > { %s626_s29 = smov 128   ;;  %s627_s3 = smov 8  }
  0x7c   : > { %411 = dma.vmem_to_hbm [thread:$0]  (%p694_p9), %s785_s8, 384, %s783_s6, %s263_s26, %s626_s29, %s626_s29, %s627_s3  }
  0x7d PF: > { %p425_p6 = scmp.ge.s32.totalorder %s620_s14, 2  ;;  %s291_s7 = sand.u32 1, %s600_s9  }
  0x7e   : > { %s292_s30 = scalar_lea.sflag [#allocation4], %s291_s7 }
  0x7f   : > { %p421_p4 = pnand %p425_p6, %p701_p11 }
  0x81   : > { %p422_p0 = pneg %p421_p4 }
  0x83   : > { %595 = dma.done.wait (%p422_p0), %s292_s30, 384  }
  0x84   : > { %597 = vsyncadd (%p422_p0), %s292_s30, 4294966912  ;;  %s21_s14 = sadd.s32 1, %s620_s14   ;;  %s841_s9 = smov %s604_s10 }
  0x85   : > { %p18_p1 = scmp.ge.s32.totalorder %s21_s14, 12   ;;  %s842_s10 = smov %s608_s11 }
  0x86   : > { %s843_s11 = smov %s699_s23  ;;  %s844_s12 = smov %s616_s13 }
  0x87   : > { %s845_s13 = smov %s847_s17  ;;  %20 = sbr.rel (!%p18_p1) target bundleno = 8 (0x8), region = 100 }
  0x8c   :  { %297 = vsyncpa [#allocation3], 1 }
  0x8d   :  { %299 = vsyncpa [#allocation3 + $0x1], 1 }
  0x8e   :  { %300 = vsyncpa [#allocation6], 1 }
  0x8f   :  { %302 = vsyncpa [#allocation6 + $0x1], 1 }
  0x90   :  { %303 = vsyncpa [#allocation4], 1 }
  0x91   :  { %305 = vsyncpa [#allocation4 + $0x1], 1 }

</bundles_post_ra>
